<compile_context>
chip_gen: v5e
topology: v5e:2x2
jax: 0.10.0
libtpu: 0.0.40
codegen_flags: <defaults>
</compile_context>

<pallas_src>
import jax
import jax.numpy as jnp
from jax.experimental import pallas as pl
from jax.experimental.pallas import tpu as pltpu

HIDDEN = 64
TB_DEFAULT = 2048  # default batch tile (lanes); multiple of 128


def ensemble_kernel(x_ref, w1_ref, b1_ref, w2_ref, b2_ref, wh_ref, bh_ref,
                    out_ref):
    # Batch sits on the lane (last) axis everywhere.
    x = x_ref[...]                                               # (1, TB) f32

    # fc1 + ReLU: K=1 matmul is an outer product -> VPU broadcast multiply.
    # Keep f32 elementwise (v5e VPU has no bf16).
    h1 = jnp.maximum(w1_ref[...] * x + b1_ref[...], 0.0)         # (64, TB)

    # fc2 + ReLU: bf16 MXU operands, f32 accumulate.
    h2 = jnp.dot(w2_ref[...].astype(jnp.bfloat16),
                 h1.astype(jnp.bfloat16),
                 preferred_element_type=jnp.float32)             # (64, TB)
    h2 = jnp.maximum(h2 + b2_ref[...], 0.0)

    # Fused mu/var heads: single (2, 64) @ (64, TB) bf16 matmul + f32 bias.
    heads = jnp.dot(wh_ref[...].astype(jnp.bfloat16),
                    h2.astype(jnp.bfloat16),
                    preferred_element_type=jnp.float32)          # (2, TB)
    heads = heads + bh_ref[...]

    # Row 0 = mu (identity), row 1 = var (exp).  Two lane-dense row stores;
    # no iota/compare/select and exp only runs on the var row.
    out_ref[0:1, :] = heads[0:1, :]
    out_ref[1:2, :] = jnp.exp(heads[1:2, :])


def ensemble_forward(x, params, *, tb=TB_DEFAULT):
    """x: (B, 1) float32.  Returns (mu, var), each (B, 1) float32."""
    B = x.shape[0]

    # Clamp the tile for small batches (tile stays a multiple of 128).
    b128 = pl.cdiv(B, 128) * 128
    tb = min(tb, b128)
    Bp = pl.cdiv(B, tb) * tb

    # Batch-on-lanes layout, padded to a multiple of the tile.
    xt = x.reshape(1, B)
    if Bp != B:
        xt = jnp.pad(xt, ((0, 0), (0, Bp - B)))

    w1, b1 = params["w1"], params["b1"]            # (64, 1), (64, 1)
    w2, b2 = params["w2"], params["b2"]            # (64, 64), (64, 1)
    wh, bh = params["w_heads"], params["b_heads"]  # (2, 64), (2, 1)

    # Whole-array, constant-index specs keep the ~17 KiB of weights resident.
    full = lambda a: pl.BlockSpec(a.shape, lambda i: (0, 0))

    grid_spec = pl.GridSpec(
        grid=(Bp // tb,),
        in_specs=[
            pl.BlockSpec((1, tb), lambda i: (0, i)),   # x tile (batch on lanes)
            full(w1), full(b1),
            full(w2), full(b2),
            full(wh), full(bh),
        ],
        out_specs=pl.BlockSpec((2, tb), lambda i: (0, i)),  # fused (mu; var)
    )

    weight_bytes = 4 * (w1.size + b1.size + w2.size + b2.size +
                        wh.size + bh.size)
    cost = pl.CostEstimate(
        flops=2 * Bp * (HIDDEN * 1 + HIDDEN * HIDDEN + 2 * HIDDEN),
        transcendentals=Bp,
        bytes_accessed=Bp * 4 + Bp * 2 * 4 + weight_bytes,
    )

    out = pl.pallas_call(
        ensemble_kernel,
        out_shape=jax.ShapeDtypeStruct((2, Bp), jnp.float32),
        grid_spec=grid_spec,
        cost_estimate=cost,
        compiler_params=pltpu.CompilerParams(
            # Batch axis is embarrassingly parallel -> shard across v7x TCs.
            dimension_semantics=("parallel",)),
    )(xt, w1, b1, w2, b2, wh, bh)

    mu = out[0, :B].reshape(B, 1)
    var = out[1, :B].reshape(B, 1)
    return mu, var


def init_params(key):
    """Deterministic init mimicking torch.nn.Linear default:
    U(-1/sqrt(fan_in), 1/sqrt(fan_in)).  Weights stored (out_features,
    in_features) like torch; biases stored as (out_features, 1) columns for
    the feature-major kernel.  The two heads are fused into (2, 64)/(2, 1)."""
    ks = jax.random.split(key, 8)

    def lin(kw, kb, fan_in, fan_out):
        bound = 1.0 / jnp.sqrt(jnp.float32(fan_in))
        w = jax.random.uniform(kw, (fan_out, fan_in), jnp.float32, -bound, bound)
        b = jax.random.uniform(kb, (fan_out, 1), jnp.float32, -bound, bound)
        return w, b

    w1, b1 = lin(ks[0], ks[1], 1, HIDDEN)
    w2, b2 = lin(ks[2], ks[3], HIDDEN, HIDDEN)
    wmu, bmu = lin(ks[4], ks[5], HIDDEN, 1)
    wvar, bvar = lin(ks[6], ks[7], HIDDEN, 1)
    w_heads = jnp.concatenate([wmu, wvar], axis=0)   # (2, 64)
    b_heads = jnp.concatenate([bmu, bvar], axis=0)   # (2, 1)
    return dict(w1=w1, b1=b1, w2=w2, b2=b2, w_heads=w_heads, b_heads=b_heads)


def reference_forward(x, p):
    """Pure-JAX f32 reference in the standard (batch, feature) layout."""
    h1 = jnp.maximum(x @ p["w1"].T + p["b1"].T, 0.0)    # (B, 64)
    h2 = jnp.maximum(h1 @ p["w2"].T + p["b2"].T, 0.0)   # (B, 64)
    heads = h2 @ p["w_heads"].T + p["b_heads"].T        # (B, 2)
    mu = heads[:, 0:1]
    var = jnp.exp(heads[:, 1:2])
    return mu, var


if __name__ == "__main__":
    key = jax.random.PRNGKey(0)
    k_params, k_x = jax.random.split(key)

    params = init_params(k_params)
    B = 256  # small demo batch; tb=128 below -> 2 grid steps exercise the grid
    x = jax.random.normal(k_x, (B, 1), jnp.float32)

    mu, var = ensemble_forward(x, params, tb=128)
    jax.block_until_ready((mu, var))

    mu_ref, var_ref = reference_forward(x, params)
    assert mu.shape == (B, 1) and var.shape == (B, 1)
    # bf16 MXU operands with f32 accumulation -> relaxed tolerance vs f32 ref.
    assert jnp.allclose(mu, mu_ref, atol=5e-2, rtol=5e-2)
    assert jnp.allclose(var, var_ref, atol=5e-2, rtol=5e-2)
    assert bool(jnp.all(var > 0))

    print("KERNEL_OK")
</pallas_src>

<mosaic_0001>
module attributes {stable_mosaic.version = 11 : i64} {
  func.func @ensemble_kernel(%arg0: i32, %arg1: memref<1x128xf32, #tpu.memory_space<vmem>>, %arg2: memref<64x1xf32, #tpu.memory_space<vmem>>, %arg3: memref<64x1xf32, #tpu.memory_space<vmem>>, %arg4: memref<64x64xf32, #tpu.memory_space<vmem>>, %arg5: memref<64x1xf32, #tpu.memory_space<vmem>>, %arg6: memref<2x64xf32, #tpu.memory_space<vmem>>, %arg7: memref<2x1xf32, #tpu.memory_space<vmem>>, %arg8: memref<2x128xf32, #tpu.memory_space<vmem>>) attributes {dimension_semantics = [#tpu.dimension_semantics<parallel>], iteration_bounds = array<i64: 2>, scalar_prefetch = 0 : i64, scratch_operands = 0 : i64, tpu.core_type = #tpu.core_type<tc>, window_params = [{transform_indices = @transform_0, window_bounds = array<i64: 1, 128>}, {pipeline_mode = #tpu.pipeline_mode<synchronous>, transform_indices = @transform_1, window_bounds = array<i64: 64, 1>}, {pipeline_mode = #tpu.pipeline_mode<synchronous>, transform_indices = @transform_2, window_bounds = array<i64: 64, 1>}, {pipeline_mode = #tpu.pipeline_mode<synchronous>, transform_indices = @transform_3, window_bounds = array<i64: 64, 64>}, {pipeline_mode = #tpu.pipeline_mode<synchronous>, transform_indices = @transform_4, window_bounds = array<i64: 64, 1>}, {pipeline_mode = #tpu.pipeline_mode<synchronous>, transform_indices = @transform_5, window_bounds = array<i64: 2, 64>}, {pipeline_mode = #tpu.pipeline_mode<synchronous>, transform_indices = @transform_6, window_bounds = array<i64: 2, 1>}, {transform_indices = @transform_7, window_bounds = array<i64: 2, 128>}]} {
    %c0 = arith.constant 0 : index
    %c0_0 = arith.constant 0 : index
    %0 = vector.load %arg1[%c0, %c0_0] : memref<1x128xf32, #tpu.memory_space<vmem>>, vector<1x128xf32>
    %c0_1 = arith.constant 0 : index
    %c0_2 = arith.constant 0 : index
    %1 = vector.load %arg2[%c0_1, %c0_2] : memref<64x1xf32, #tpu.memory_space<vmem>>, vector<64x1xf32>
    %2 = vector.broadcast %1 : vector<64x1xf32> to vector<64x128xf32>
    %3 = vector.broadcast %0 : vector<1x128xf32> to vector<64x128xf32>
    %4 = arith.mulf %2, %3 : vector<64x128xf32>
    %c0_3 = arith.constant 0 : index
    %c0_4 = arith.constant 0 : index
    %5 = vector.load %arg3[%c0_3, %c0_4] : memref<64x1xf32, #tpu.memory_space<vmem>>, vector<64x1xf32>
    %6 = vector.broadcast %5 : vector<64x1xf32> to vector<64x128xf32>
    %7 = arith.addf %4, %6 : vector<64x128xf32>
    %cst = arith.constant 0.000000e+00 : f32
    %8 = vector.broadcast %cst : f32 to vector<64x128xf32>
    %9 = arith.maximumf %7, %8 : vector<64x128xf32>
    %c0_5 = arith.constant 0 : index
    %c0_6 = arith.constant 0 : index
    %10 = vector.load %arg4[%c0_5, %c0_6] : memref<64x64xf32, #tpu.memory_space<vmem>>, vector<64x64xf32>
    %11 = arith.truncf %10 : vector<64x64xf32> to vector<64x64xbf16>
    %12 = arith.truncf %9 : vector<64x128xf32> to vector<64x128xbf16>
    %cst_7 = arith.constant dense<0.000000e+00> : vector<64x128xf32>
    %13 = tpu.matmul %11, %12, %cst_7 {dimension_numbers = #tpu.dot_dimension_numbers<[1], [0], [0], [1], [0, 0, 1, 1], [], []>} : vector<64x64xbf16>, vector<64x128xbf16>, vector<64x128xf32> -> vector<64x128xf32>
    %c0_8 = arith.constant 0 : index
    %c0_9 = arith.constant 0 : index
    %14 = vector.load %arg5[%c0_8, %c0_9] : memref<64x1xf32, #tpu.memory_space<vmem>>, vector<64x1xf32>
    %15 = vector.broadcast %14 : vector<64x1xf32> to vector<64x128xf32>
    %16 = arith.addf %13, %15 : vector<64x128xf32>
    %cst_10 = arith.constant 0.000000e+00 : f32
    %17 = vector.broadcast %cst_10 : f32 to vector<64x128xf32>
    %18 = arith.maximumf %16, %17 : vector<64x128xf32>
    %c0_11 = arith.constant 0 : index
    %c0_12 = arith.constant 0 : index
    %19 = vector.load %arg6[%c0_11, %c0_12] : memref<2x64xf32, #tpu.memory_space<vmem>>, vector<2x64xf32>
    %20 = arith.truncf %19 : vector<2x64xf32> to vector<2x64xbf16>
    %21 = arith.truncf %18 : vector<64x128xf32> to vector<64x128xbf16>
    %cst_13 = arith.constant dense<0.000000e+00> : vector<2x128xf32>
    %22 = tpu.matmul %20, %21, %cst_13 {dimension_numbers = #tpu.dot_dimension_numbers<[1], [0], [0], [1], [0, 0, 1, 1], [], []>} : vector<2x64xbf16>, vector<64x128xbf16>, vector<2x128xf32> -> vector<2x128xf32>
    %c0_14 = arith.constant 0 : index
    %c0_15 = arith.constant 0 : index
    %23 = vector.load %arg7[%c0_14, %c0_15] : memref<2x1xf32, #tpu.memory_space<vmem>>, vector<2x1xf32>
    %24 = vector.broadcast %23 : vector<2x1xf32> to vector<2x128xf32>
    %25 = arith.addf %22, %24 : vector<2x128xf32>
    %26 = vector.extract_strided_slice %25 {offsets = [0, 0], sizes = [1, 128], strides = [1, 1]} : vector<2x128xf32> to vector<1x128xf32>
    %c0_16 = arith.constant 0 : index
    %c0_17 = arith.constant 0 : index
    %27 = vector.load %arg8[%c0_16, %c0_17] : memref<2x128xf32, #tpu.memory_space<vmem>>, vector<1x128xf32>
    tpu.vector_store %arg8[%c0_16, %c0_17], %26 {strides = array<i32>} : memref<2x128xf32, #tpu.memory_space<vmem>>, vector<1x128xf32>,
    %28 = vector.extract_strided_slice %25 {offsets = [1, 0], sizes = [1, 128], strides = [1, 1]} : vector<2x128xf32> to vector<1x128xf32>
    %29 = math.exp %28 : vector<1x128xf32>
    %c1 = arith.constant 1 : index
    %c0_18 = arith.constant 0 : index
    %30 = vector.load %arg8[%c1, %c0_18] : memref<2x128xf32, #tpu.memory_space<vmem>>, vector<1x128xf32>
    tpu.vector_store %arg8[%c1, %c0_18], %29 {strides = array<i32>} : memref<2x128xf32, #tpu.memory_space<vmem>>, vector<1x128xf32>,
    return
  }
  func.func @transform_0(%arg0: i32) -> (i32, i32) {
    %c0_i32 = arith.constant 0 : i32
    %c0_i32_0 = arith.constant 0 : i32
    return %c0_i32, %arg0 : i32, i32
  }
  func.func @transform_1(%arg0: i32) -> (i32, i32) {
    %c0_i32 = arith.constant 0 : i32
    %c0_i32_0 = arith.constant 0 : i32
    %c0_i32_1 = arith.constant 0 : i32
    return %c0_i32, %c0_i32_0 : i32, i32
  }
  func.func @transform_2(%arg0: i32) -> (i32, i32) {
    %c0_i32 = arith.constant 0 : i32
    %c0_i32_0 = arith.constant 0 : i32
    %c0_i32_1 = arith.constant 0 : i32
    return %c0_i32, %c0_i32_0 : i32, i32
  }
  func.func @transform_3(%arg0: i32) -> (i32, i32) {
    %c0_i32 = arith.constant 0 : i32
    %c0_i32_0 = arith.constant 0 : i32
    %c0_i32_1 = arith.constant 0 : i32
    return %c0_i32, %c0_i32_0 : i32, i32
  }
  func.func @transform_4(%arg0: i32) -> (i32, i32) {
    %c0_i32 = arith.constant 0 : i32
    %c0_i32_0 = arith.constant 0 : i32
    %c0_i32_1 = arith.constant 0 : i32
    return %c0_i32, %c0_i32_0 : i32, i32
  }
  func.func @transform_5(%arg0: i32) -> (i32, i32) {
    %c0_i32 = arith.constant 0 : i32
    %c0_i32_0 = arith.constant 0 : i32
    %c0_i32_1 = arith.constant 0 : i32
    return %c0_i32, %c0_i32_0 : i32, i32
  }
  func.func @transform_6(%arg0: i32) -> (i32, i32) {
    %c0_i32 = arith.constant 0 : i32
    %c0_i32_0 = arith.constant 0 : i32
    %c0_i32_1 = arith.constant 0 : i32
    return %c0_i32, %c0_i32_0 : i32, i32
  }
  func.func @transform_7(%arg0: i32) -> (i32, i32) {
    %c0_i32 = arith.constant 0 : i32
    %c0_i32_0 = arith.constant 0 : i32
    return %c0_i32, %arg0 : i32, i32
  }
}

</mosaic_0001>

<bundles_post_ra>
// kernel: tpu_custom_call.1
= control target key start
LH: loop header
LB: loop body
LE: loop exit
PB: predicated region body
PF: predicated region fallthrough
CT: control target
= control target key end

     0   :  { %12 = vsyncpa [#allocation3], 0  ;;  %s987_s0 = inlined_call_operand.vmem [shape: f32[1,256], index: 0, kind: input, shape index: {}]   ;;  %s988_s1 = inlined_call_operand.vmem [shape: f32[64,1], index: 1, kind: input, shape index: {}]   ;;  %s989_s2 = inlined_call_operand.vmem [shape: f32[64,1], index: 2, kind: input, shape index: {}]   ;;  %s990_s3 = inlined_call_operand.vmem [shape: f32[64,64], index: 3, kind: input, shape index: {}]   ;;  %s991_s4 = inlined_call_operand.vmem [shape: f32[64,1], index: 4, kind: input, shape index: {}]   ;;  %s992_s5 = inlined_call_operand.vmem [shape: f32[2,64], index: 5, kind: input, shape index: {}]   ;;  %s993_s6 = inlined_call_operand.vmem [shape: f32[2,1], index: 6, kind: input, shape index: {}]   ;;  %s994_s7 = inlined_call_operand.hbm [shape: f32[2,256], index: 7, kind: output, shape index: {}]  }
   0x1   :  { %14 = vsyncpa [#allocation3 + $0x1], 0  ;;  %s787_s24 = smov 0   ;;  %s789_s25 = smov 0  }
   0x2   :  { %s791_s26 = smov 0   ;;  %s793_s27 = smov 0  }
   0x3 LB: > { %s808_s28 = sadd.s32 4294967295, %s744_s27   ;;  %s614_s29 = sadd.s32 4294967294, %s744_s27   ;;  %s744_s27 = sphi %s793_s27, %s1000_s27   ;;  %s740_s26 = sphi %s791_s26, %s999_s26   ;;  %s736_s25 = sphi %s789_s25, %s998_s25   ;;  %s732_s24 = sphi %s787_s24, %s997_s24  }
   0x4   : > { %s812_s30 = sadd.s32 1, %s744_s27   ;;  %s179_s8 = sadd.s32 1, %s740_s26 }
   0x5   : > { %s176_s9 = ssub.s32 %s744_s27, %s812_s30  ;;  %p189_p0 = scmp.ne.s32.totalorder %s740_s26, %s736_s25 }
   0x6   : > { %p177_p1 = scmp.eq.s32.totalorder %s176_s9, 0  ;;  %p190_p2 = scmp.eq.s32.totalorder %s808_s28, 1 }
   0x7   : > { %p195_p3 = scmp.ne.s32.totalorder %s736_s25, %s732_s24  ;;  %p196_p4 = scmp.eq.s32.totalorder %s614_s29, 1 }
   0x8   : > { %s823_s10 = scalar_select %p177_p1, %s740_s26, %s179_s8  }
   0x9   : > { %p825_p5 = por %p190_p2, %p189_p0  ;;  %p829_p6 = por %p196_p4, %p195_p3 }
   0xa   : > { %p617_p7 = scmp.ge.s32.totalorder %s744_s27, 1  ;;  %p238_p8 = scmp.lt.s32.totalorder %s744_s27, 3 }
   0xc   : > { %p239_p9 = pnand %p617_p7, %p238_p8 }
   0xd   : > { %p268_p10 = scmp.lt.s32.totalorder (!%p239_p9), %s808_s28, 1  ;;  %s265_s23 = sand.u32 (!%p239_p9), 1, %s736_s25  }
   0xe   : > { %242 = sbr.rel (%p239_p9) target bundleno = 504 (0x1f8), region = 48  ;;  %s618_s29 = sshll.u32 (!%p239_p9), %s265_s23, 1 }
   0xf   : > { %s625_s8 = sshll.u32 (!%p239_p9), %s808_s28, 1  ;;  %s267_s9 = scalar_lea.vmem (!%p239_p9), [#allocation2], %s618_s29 }
  0x10   : > { %s553_s15 = scalar_lea.hbm (!%p239_p9), %s994_s7, %s625_s8  ;;  %s555_s16 = sshll.u32 (!%p239_p9), %s267_s9, 4  ;;  %s556_s16 = int_to_ptr.vmem [resolvable:$true] %s555_s16 }
  0x11   : > { %s557_s17 = sshll.u32 (!%p239_p9), %s553_s15, 4  ;;  %s543_s18 = scalar_lea.sflag (!%p239_p9), [#allocation3], %s265_s23  ;;  %s558_s17 = int_to_ptr.hbm [resolvable:$true] %s557_s17 }
  0x12   : > { %s702_s21 = scalar_lea.hbm (!%p239_p9), %s994_s7, 4 }
  0x13   : > { %v338_v0 = vld [vmem:[%s989_s2 + $0x30] sm:$0xff]  ;;  %v277_v2 = vld [vmem:[%s988_s1 + $0x20] sm:$0xff]  ;;  %v746_v3 = vmov 0   ;;  %s846_s19 = scalar_select %p268_p10, %s808_s28, 1  ;;  %v339_v4 = vld [vmem:[%s989_s2 + $0x38] sm:$0xff]  ;;  %vm460_vm0 = vcmask 523264  }
  0x14   : > { %v279_v1 = vld [vmem:[%s988_s1 + $0x30] sm:$0xff]  ;;  %678 = vset.pattern.permute.xlu2 %v746_v3  ;;  %677 = vset.pattern.permute.xlu1 %v746_v3  ;;  %v280_v5 = vld [vmem:[%s988_s1 + $0x38] sm:$0xff]  ;;  %v278_v6 = vld [vmem:[%s988_s1 + $0x28] sm:$0xff] }
  0x15   : > { %676 = vset.pattern.permute.xlu0 %v746_v3  ;;  %372 = vperm.xlu1 %677, %v338_v0   ;;  %s270_s22 = scalar_lea.vmem %s987_s0, %s846_s19  ;;  %v337_v7 = vld [vmem:[%s989_s2 + $0x28] sm:$0xff]  ;;  %v336_v8 = vld [vmem:[%s989_s2 + $0x20] sm:$0xff]  ;;  %v275_v9 = vld [vmem:[%s988_s1 + $0x10] sm:$0xff]  ;;  %s696_s19 = sshra.s32 %s558_s17, 4  ;;  %s697_s19 = int_to_ptr.hbm [resolvable:$true] %s696_s19 }
  0x16   : > { %313 = vperm.xlu0 %676, %v279_v1   ;;  %303 = vperm.xlu2 %678, %v277_v2   ;;  %v334_v10 = vld [vmem:[%s989_s2 + $0x10] sm:$0xff]  ;;  %v276_v11 = vld [vmem:[%s988_s1 + $0x18] sm:$0xff]  ;;  %v274_v13 = vld [vmem:[%s988_s1 + $0x8] sm:$0xff]  ;;  %s698_s28 = scalar_lea.hbm %s697_s19, 2  ;;  %p703_p0 = scmp.lt.s32.totalorder %s697_s19, %s994_s7 }
  0x17   : > { %v335_v12 = vld [vmem:[%s989_s2 + $0x18] sm:$0xff]  ;;  %v332_v14 = vld [vmem:[%s989_s2] sm:$0xff]  ;;  %v418_v16 = vld [vmem:[%s991_s4 + $0x30] sm:$0xff]  ;;  %p699_p11 = scmp.ne.s32.totalorder %s697_s19, %s698_s28  ;;  %p704_p1 = scmp.lt.s32.totalorder %s702_s21, %s698_s28 }
  0x18   : > { %v273_v15 = vld [vmem:[%s988_s1] sm:$0xff]  ;;  %v419_v17 = vld [vmem:[%s991_s4 + $0x38] sm:$0xff]  ;;  %v333_v18 = vld [vmem:[%s989_s2 + $0x8] sm:$0xff] }
  0x19   : > { %v417_v19 = vld [vmem:[%s991_s4 + $0x28] sm:$0xff]  ;;  %v414_v20 = vld [vmem:[%s991_s4 + $0x10] sm:$0xff]  ;;  %v416_v21 = vld [vmem:[%s991_s4 + $0x20] sm:$0xff]  ;;  %p700_p12 = pnand %p699_p11, %p825_p5  ;;  %p705_p2 = por %p704_p1, %p703_p0 }
  0x1a   : > { %v412_v22 = vld [vmem:[%s991_s4] sm:$0xff]  ;;  %v413_v23 = vld [vmem:[%s991_s4 + $0x8] sm:$0xff]  ;;  %v415_v24 = vld [vmem:[%s991_s4 + $0x18] sm:$0xff] }
  0x1b   : > { %v516_v25 = vld [vmem:[%s993_s6] sm:$0x3]  ;;  %p701_p13 = pneg %p700_p12 }
  0x1c   : > { %v679_v29 = vld [vmem:[%s270_s22] ss:$0 sm:$0xff] }
  0x1d   : > { %377 = vperm.xlu1 %677, %v339_v4   ;;  %v396_v4 = vld [vmem:[%s990_s3] sm:$0xff]  ;;  %p706_p3 = pnand %p705_p2, %p701_p13 }
  0x1e   : > { %318 = vperm.xlu0 %676, %v280_v5   ;;  %308 = vperm.xlu2 %678, %v278_v6  }
  0x25   : > { %367 = vperm.xlu1 %677, %v337_v7   ;;  %v397_v7 = vld [vmem:[%s990_s3 + $0x8] sm:$0xff] }
  0x26   : > { %362 = vperm.xlu0 %676, %v336_v8   ;;  %293 = vperm.xlu2 %678, %v275_v9   ;;  %v398_v8 = vld [vmem:[%s990_s3 + $0x10] sm:$0xff]  ;;  %v399_v9 = vld [vmem:[%s990_s3 + $0x18] sm:$0xff] }
  0x2d   : > { %352 = vperm.xlu1 %677, %v334_v10   ;;  %v400_v10 = vld [vmem:[%s990_s3 + $0x20] sm:$0xff] }
  0x2e   : > { %298 = vperm.xlu0 %676, %v276_v11   ;;  %357 = vperm.xlu2 %678, %v335_v12   ;;  %v401_v11 = vld [vmem:[%s990_s3 + $0x28] sm:$0xff] }
  0x35   : > { %288 = vperm.xlu1 %677, %v274_v13   ;;  %v404_v13 = vpack.c.bf16 %v397_v7, %v396_v4 }
  0x36   : > { %342 = vperm.xlu2 %678, %v332_v14   ;;  %283 = vperm.xlu0 %676, %v273_v15   ;;  %v405_v14 = vpack.c.bf16 %v399_v9, %v398_v8  ;;  %v406_v15 = vpack.c.bf16 %v401_v11, %v400_v10 }
  0x3d   : > { %452 = vperm.xlu1 %677, %v418_v16   ;;  %v402_v16 = vld [vmem:[%s990_s3 + $0x30] sm:$0xff] }
  0x3e   : > { %457 = vperm.xlu2 %678, %v419_v17   ;;  %347 = vperm.xlu0 %676, %v333_v18   ;;  %v403_v17 = vld [vmem:[%s990_s3 + $0x38] sm:$0xff] }
  0x3f   : > { %v407_v18 = vpack.c.bf16 %v403_v17, %v402_v16 }
  0x45   : > { %447 = vperm.xlu1 %677, %v417_v19  }
  0x46   : > { %432 = vperm.xlu2 %678, %v414_v20   ;;  %442 = vperm.xlu0 %676, %v416_v21  }
  0x4d   : > { %422 = vperm.xlu1 %677, %v412_v22  }
  0x4e   : > { %427 = vperm.xlu2 %678, %v413_v23   ;;  %437 = vperm.xlu0 %676, %v415_v24  }
  0x56   : > { %519 = vperm.xlu0 %676, %v516_v25  }
  0x70   : > { %v304_v26 = vpop.permute.xlu2 %303 }
  0x71   : > { %v328_v40 = vmul.f32 %v679_v29, %v304_v26 }
  0x78   : > { %v309_v31 = vpop.permute.xlu2 %308 }
  0x79   : > { %v329_v39 = vmul.f32 %v679_v29, %v309_v31 }
  0x80   : > { %v294_v43 = vpop.permute.xlu2 %293 }
  0x81   : > { %v326_v50 = vmul.f32 %v679_v29, %v294_v43 }
  0x87   : > { %v373_v27 = vpop.permute.xlu1 %372 }
  0x88   : > { %v314_v28 = vpop.permute.xlu0 %313  ;;  %v358_v55 = vpop.permute.xlu2 %357 }
  0x89   : > { %v330_v30 = vmul.f32 %v679_v29, %v314_v28 }
  0x8b   : > { %v386_v34 = vadd.f32 %v373_v27, %v330_v30 }
  0x8d   : > { %v394_v37 = vmax.f32 %v386_v34, 0.0 }
  0x8f   : > { %v378_v32 = vpop.permute.xlu1 %377 }
  0x90   : > { %v319_v33 = vpop.permute.xlu0 %318  ;;  %v343_v63 = vpop.permute.xlu2 %342 }
  0x91   : > { %v331_v35 = vmul.f32 %v679_v29, %v319_v33 }
  0x93   : > { %v387_v36 = vadd.f32 %v378_v32, %v331_v35 }
  0x95   : > { %v395_v38 = vmax.f32 %v387_v36, 0.0 }
  0x97   : > { %v368_v41 = vpop.permute.xlu1 %367  ;;  %v411_v42 = vpack.c.bf16 %v395_v38, %v394_v37 }
  0x98   : > { %v385_v44 = vadd.f32 %v368_v41, %v329_v39  ;;  %v363_v45 = vpop.permute.xlu0 %362  ;;  %v458_v21 = vpop.permute.xlu2 %457 }
  0x99   : > { %v384_v46 = vadd.f32 %v363_v45, %v328_v40  ;;  %477 = vmatpush.bf16.msra.mxu0 %v411_v42  ;;  %628 = vmatpush.bf16.msra.mxu2 %v411_v42 }
  0x9a   : > { %v393_v47 = vmax.f32 %v385_v44, 0.0  ;;  %629 = vmatpush.bf16.msra.mxu3 %v411_v42 }
  0x9b   : > { %v392_v48 = vmax.f32 %v384_v46, 0.0 }
  0x9d   : > { %v410_v49 = vpack.c.bf16 %v393_v47, %v392_v48 }
  0x9f   : > { %478 = vmatpush.bf16.msra.mxu0 %v410_v49  ;;  %630 = vmatpush.bf16.msra.mxu2 %v410_v49  ;;  %v353_v51 = vpop.permute.xlu1 %352 }
  0xa0   : > { %631 = vmatpush.bf16.msra.mxu3 %v410_v49  ;;  %v299_v52 = vpop.permute.xlu0 %298  ;;  %v382_v53 = vadd.f32 %v353_v51, %v326_v50  ;;  %v433_v27 = vpop.permute.xlu2 %432 }
  0xa1   : > { %v327_v54 = vmul.f32 %v679_v29, %v299_v52 }
  0xa2   : > { %v390_v57 = vmax.f32 %v382_v53, 0.0 }
  0xa3   : > { %v383_v56 = vadd.f32 %v358_v55, %v327_v54  ;;  %v510_v54 = vld [vmem:[%s992_s5] sm:$0x3] }
  0xa5   : > { %v391_v58 = vmax.f32 %v383_v56, 0.0  ;;  %v511_v56 = vpack.c.bf16 %v510_v54, %v510_v54 }
  0xa7   : > { %v409_v59 = vpack.c.bf16 %v391_v58, %v390_v57  ;;  %v289_v62 = vpop.permute.xlu1 %288 }
  0xa8   : > { %v284_v60 = vpop.permute.xlu0 %283  ;;  %v325_v0 = vmul.f32 %v679_v29, %v289_v62  ;;  %v428_v44 = vpop.permute.xlu2 %427 }
  0xa9   : > { %479 = vmatpush.bf16.msra.mxu0 %v409_v59  ;;  %632 = vmatpush.bf16.msra.mxu2 %v409_v59  ;;  %v324_v61 = vmul.f32 %v679_v29, %v284_v60 }
  0xaa   : > { %633 = vmatpush.bf16.msra.mxu3 %v409_v59 }
  0xab   : > { %v380_v1 = vadd.f32 %v343_v63, %v324_v61 }
  0xad   : > { %v388_v5 = vmax.f32 %v380_v1, 0.0 }
  0xaf   : > { %v453_v22 = vpop.permute.xlu1 %452 }
  0xb0   : > { %v348_v2 = vpop.permute.xlu0 %347 }
  0xb1   : > { %v381_v3 = vadd.f32 %v348_v2, %v325_v0 }
  0xb3   : > { %v389_v6 = vmax.f32 %v381_v3, 0.0 }
  0xb5   : > { %v408_v12 = vpack.c.bf16 %v389_v6, %v388_v5 }
  0xb7   : > { %480 = vmatpush.bf16.msra.mxu0 %v408_v12  ;;  %634 = vmatpush.bf16.msra.mxu2 %v408_v12  ;;  %v448_v29 = vpop.permute.xlu1 %447 }
  0xb8   : > { %635 = vmatpush.bf16.msra.mxu3 %v408_v12  ;;  %v443_v25 = vpop.permute.xlu0 %442 }
  0xba   : > { %619 = vmatmul.msk.bf16.vlgmr.msra.gmra.mxu0 %vm460_vm0, %v404_v13  ;;  %620 = vmatmul.msk.bf16.vlgmr.msra.gmra.mxu2 %vm460_vm0, %v405_v14 }
  0xbb   : > { %621 = vmatmul.msk.bf16.vlgmr.msra.gmra.mxu3 %vm460_vm0, %v406_v15 }
  0xbf   : > { %v423_v48 = vpop.permute.xlu1 %422 }
  0xc0   : > { %v438_v37 = vpop.permute.xlu0 %437 }
  0xc8   : > { %v520_v57 = vpop.permute.xlu0 %519 }
  0xcb   : > { %622 = vmatmul.msk.bf16.gmra.mxu3 %vm460_vm0, %v407_v18 }
 0x137   : > { %v482_v26 = vpop.f32.mrf.mxu0 }
 0x138   : > { %v483_v49 = vadd.f32 %v482_v26, %v423_v48 }
 0x13a   : > { %v502_v53 = vmax.f32 %v483_v49, 0.0 }
 0x13d   : > { %v487_v23 = vpop.f32.mrf.mxu2 }
 0x13e   : > { %v492_v19 = vpop.f32.mrf.mxu3  ;;  %v488_v42 = vadd.f32 %v487_v23, %v433_v27 }
 0x13f   : > { %v493_v34 = vadd.f32 %v492_v19, %v443_v25  ;;  %v484_v41 = vpop.f32.mrf.mxu0 }
 0x140   : > { %v485_v45 = vadd.f32 %v484_v41, %v428_v44  ;;  %v504_v50 = vmax.f32 %v488_v42, 0.0 }
 0x141   : > { %v506_v43 = vmax.f32 %v493_v34, 0.0 }
 0x142   : > { %v503_v51 = vmax.f32 %v485_v45, 0.0 }
 0x144   : > { %v512_v55 = vpack.c.bf16 %v503_v51, %v502_v53 }
 0x145   : > { %v489_v33 = vpop.f32.mrf.mxu2 }
 0x146   : > { %v494_v20 = vpop.f32.mrf.mxu3  ;;  %v490_v38 = vadd.f32 %v489_v33, %v438_v37 }
 0x147   : > { %v495_v31 = vadd.f32 %v494_v20, %v448_v29 }
 0x148   : > { %v505_v46 = vmax.f32 %v490_v38, 0.0 }
 0x149   : > { %v507_v39 = vmax.f32 %v495_v31, 0.0 }
 0x14a   : > { %v513_v52 = vpack.c.bf16 %v505_v46, %v504_v50 }
 0x14b   : > { %v514_v47 = vpack.c.bf16 %v507_v39, %v506_v43 }
 0x14e   : > { %v497_v24 = vpop.f32.mrf.mxu3 }
 0x14f   : > { %v498_v28 = vadd.f32 %v497_v24, %v453_v22 }
 0x151   : > { %v508_v35 = vmax.f32 %v498_v28, 0.0 }
 0x156   : > { %v499_v30 = vpop.f32.mrf.mxu3 }
 0x157   : > { %v500_v32 = vadd.f32 %v499_v30, %v458_v21 }
 0x159   : > { %v509_v36 = vmax.f32 %v500_v32, 0.0 }
 0x15b   : > { %v515_v40 = vpack.c.bf16 %v509_v36, %v508_v35 }
 0x15d   : > { %529 = vmatpush.bf16.msra.mxu1 %v515_v40 }
 0x161   : > { %530 = vmatpush.bf16.msra.mxu1 %v514_v47 }
 0x165   : > { %531 = vmatpush.bf16.msra.mxu1 %v513_v52 }
 0x169   : > { %532 = vmatpush.bf16.msra.mxu1 %v512_v55 }
 0x16c   : > { %623 = vmatmul.msk.bf16.vlgmr.msra.gmra.mxu1 %vm460_vm0, %v511_v56 }
 0x1e9   : > { %v534_v58 = vpop.f32.mrf.mxu1 }
 0x1ea   : > { %v535_v59 = vadd.f32 %v534_v58, %v520_v57 }
 0x1ec   : > { %538 = vst [vmem:[%s267_s9] sm:$0x1] %v535_v59  ;;  %v539_v60 = vmul.f32 1.442695, %v535_v59 }
 0x1ee   : > { %680 = vpow2.f32 %v539_v60 }
 0x1f1   : > { %v536_v61 = vpop.f32.mrf.mxu1 }
 0x1f4   : > { %v681_v62 = vpop.eup %680 }
 0x1f5   : > { %541 = vst [vmem:[%s267_s9] sm:$0x2] %v681_v62 }
 0x1f6   : > { %709 = shalt.err (!%p706_p3)
}
 0x1f7   : > { %636 = dma.vmem_to_hbm [thread:$0]  (%p825_p5), %s556_s16, 32, %s558_s17, %s543_s18  }
 0x1f8 PF: > { %p642_p4 = scmp.ge.s32.totalorder %s744_s27, 2  ;;  %s569_s23 = sand.u32 1, %s732_s24  }
 0x1f9   : > { %s570_s9 = scalar_lea.sflag [#allocation3], %s569_s23 }
 0x1fa   : > { %p639_p7 = pnand %p642_p4, %p829_p6 }
 0x1fc   : > { %p640_p8 = pneg %p639_p7 }
 0x1fe   : > { %727 = dma.done.wait (%p640_p8), %s570_s9, 32  }
 0x1ff   : > { %729 = vsyncadd (%p640_p8), %s570_s9, 4294967264  ;;  %p17_p9 = scmp.ge.s32.totalorder %s812_s30, 4   ;;  %s997_s24 = smov %s736_s25 }
 0x200   : > { %s998_s25 = smov %s740_s26  ;;  %s999_s26 = smov %s823_s10 }
 0x201   : > { %s1000_s27 = smov %s812_s30  ;;  %19 = sbr.rel (!%p17_p9) target bundleno = 3 (0x3), region = 83 }
 0x206   :  { %576 = vsyncpa [#allocation3], 1 }
 0x207   :  { %578 = vsyncpa [#allocation3 + $0x1], 1 }

</bundles_post_ra>
